<compile_context>
chip_gen: v5e
topology: v5e:2x2
jax: 0.10.0
libtpu: 0.0.40
codegen_flags: <defaults>
</compile_context>

<pallas_src>
import jax
import jax.numpy as jnp
from jax.experimental import pallas as pl
from jax.experimental.pallas import tpu as pltpu


# --------------------------------------------------------------------------- #
# helpers
# --------------------------------------------------------------------------- #
def _round_up(x, m):
    return ((x + m - 1) // m) * m


def _largest_divisor_tile(dim, cands):
    for c in cands:
        if dim % c == 0:
            return c
    return dim


def _pad_and_tile(n, cands, align):
    """Pick the largest candidate tile with modest padding waste; return
    (padded_dim, tile) with padded_dim a multiple of tile and >= n."""
    n_al = max(_round_up(max(n, 1), align), align)
    for c in cands:
        padded = _round_up(n_al, c)
        if padded - n_al <= padded // 4:
            return padded, c
    return n_al, align


# --------------------------------------------------------------------------- #
# kernel 1: per-etype linear  Wh = feat @ W^T   (bias deferred to aggregation)
# --------------------------------------------------------------------------- #
def _linear_simple_kernel(x_ref, w_ref, o_ref):
    # Whole reduction dim in one block -> no K axis, no scratch.
    o_ref[...] = jnp.dot(x_ref[...], w_ref[...],
                         preferred_element_type=jnp.float32).astype(o_ref.dtype)


def _linear_reduce_kernel(x_ref, w_ref, o_ref, acc_ref):
    @pl.when(pl.program_id(2) == 0)
    def _():
        acc_ref[...] = jnp.zeros_like(acc_ref)

    acc_ref[...] += jnp.dot(x_ref[...], w_ref[...],
                            preferred_element_type=jnp.float32)

    @pl.when(pl.program_id(2) == pl.num_programs(2) - 1)
    def _():
        o_ref[...] = acc_ref[...].astype(o_ref.dtype)


def _linear_bf16(x_pad, w_pad, tm):
    """x_pad: (m_pad, in_pad) bf16, w_pad: (in_pad, out_pad) bf16 -> bf16 Wh."""
    m_pad, in_pad = x_pad.shape
    out_pad = w_pad.shape[1]
    tn = out_pad if out_pad <= 512 else _largest_divisor_tile(out_pad, (512, 256, 128))

    if in_pad <= 1024:
        grid = (m_pad // tm, out_pad // tn)
        return pl.pallas_call(
            _linear_simple_kernel,
            out_shape=jax.ShapeDtypeStruct((m_pad, out_pad), jnp.bfloat16),
            grid_spec=pltpu.PrefetchScalarGridSpec(
                num_scalar_prefetch=0,
                grid=grid,
                in_specs=[
                    pl.BlockSpec((tm, in_pad), lambda i, j: (i, 0)),
                    pl.BlockSpec((in_pad, tn), lambda i, j: (0, j)),
                ],
                out_specs=pl.BlockSpec((tm, tn), lambda i, j: (i, j)),
            ),
            compiler_params=pltpu.CompilerParams(
                dimension_semantics=("parallel", "parallel")),
            cost_estimate=pl.CostEstimate(
                flops=int(2 * m_pad * in_pad * out_pad),
                transcendentals=0,
                bytes_accessed=int(2 * (m_pad * in_pad + in_pad * out_pad
                                        + m_pad * out_pad))),
        )(x_pad, w_pad)

    tk = _largest_divisor_tile(in_pad, (512, 256, 128))
    grid = (m_pad // tm, out_pad // tn, in_pad // tk)
    return pl.pallas_call(
        _linear_reduce_kernel,
        out_shape=jax.ShapeDtypeStruct((m_pad, out_pad), jnp.bfloat16),
        grid_spec=pltpu.PrefetchScalarGridSpec(
            num_scalar_prefetch=0,
            grid=grid,
            in_specs=[
                pl.BlockSpec((tm, tk), lambda i, j, k: (i, k)),
                pl.BlockSpec((tk, tn), lambda i, j, k: (k, j)),
            ],
            out_specs=pl.BlockSpec((tm, tn), lambda i, j, k: (i, j)),
            scratch_shapes=[pltpu.VMEM((tm, tn), jnp.float32)],
        ),
        compiler_params=pltpu.CompilerParams(
            dimension_semantics=("parallel", "parallel", "arbitrary")),
        cost_estimate=pl.CostEstimate(
            flops=int(2 * m_pad * in_pad * out_pad),
            transcendentals=0,
            bytes_accessed=int(2 * (m_pad * in_pad + in_pad * out_pad
                                    + m_pad * out_pad))),
    )(x_pad, w_pad)


# --------------------------------------------------------------------------- #
# kernel 2: stacked-etype mean aggregation + cross-etype sum
#   out[dst] = bias_total[dst] + sum_e inv_deg_e[dst] * (adj_e @ Wh_e)[dst]
# --------------------------------------------------------------------------- #
def _agg_kernel(adj_ref, wh_ref, inv_ref, bias_ref, out_ref):
    e = pl.program_id(2)
    k = pl.program_id(3)

    # First visit of this output tile: initialize with the precomputed,
    # degree-gated cross-etype bias (deferred nn.Linear bias).
    @pl.when((e == 0) & (k == 0))
    def _():
        out_ref[...] = bias_ref[...]

    # MXU: int8 (0/1) adjacency upcast to bf16 in-register; bf16 Wh; f32 acc.
    part = jnp.dot(adj_ref[0].astype(jnp.bfloat16), wh_ref[0],
                   preferred_element_type=jnp.float32)
    # per-dst inverse in-degree kept in f32 (exact mean); accumulate over e, k
    # directly into the VMEM-resident f32 output block (no scratch / finalize).
    out_ref[...] += inv_ref[0] * part


def rgcn_dst_aggregate(adj_stack, wh_stack, inv_stack, bias_total, *, tm, tk, tn):
    n_et, d_pad, s_pad = adj_stack.shape
    out_pad = wh_stack.shape[2]
    grid = (d_pad // tm, out_pad // tn, n_et, s_pad // tk)

    # live VMEM estimate: double-buffered inputs + resident f32 output block
    est = 2 * (tm * tk * 1 + tk * tn * 2 + tm * 4 + tm * tn * 4) + 2 * tm * tn * 4
    vmem_limit = int(min(48 * (1 << 20), max(16 * (1 << 20), 2 * est)))

    flops = 2.0 * n_et * d_pad * s_pad * out_pad
    bytes_accessed = (adj_stack.size                       # int8, streamed once
                      + wh_stack.size * 2 * (d_pad // tm)  # bf16, per dst tile
                      + d_pad * out_pad * 4 * 2            # bias read + out write
                      + inv_stack.size * 4)
    return pl.pallas_call(
        _agg_kernel,
        out_shape=jax.ShapeDtypeStruct((d_pad, out_pad), jnp.float32),
        grid_spec=pltpu.PrefetchScalarGridSpec(
            num_scalar_prefetch=0,
            grid=grid,
            in_specs=[
                pl.BlockSpec((1, tm, tk), lambda i, j, e, k: (e, i, k)),  # adj i8
                pl.BlockSpec((1, tk, tn), lambda i, j, e, k: (e, k, j)),  # Wh bf16
                pl.BlockSpec((1, tm, 1), lambda i, j, e, k: (e, i, 0)),   # 1/deg f32
                pl.BlockSpec((tm, tn), lambda i, j, e, k: (i, j)),        # bias f32
            ],
            out_specs=pl.BlockSpec((tm, tn), lambda i, j, e, k: (i, j)),
        ),
        compiler_params=pltpu.CompilerParams(
            dimension_semantics=("parallel", "parallel", "arbitrary", "arbitrary"),
            vmem_limit_bytes=vmem_limit),
        cost_estimate=pl.CostEstimate(
            flops=int(flops), transcendentals=0,
            bytes_accessed=int(bytes_accessed)),
    )(adj_stack, wh_stack, inv_stack, bias_total)


# --------------------------------------------------------------------------- #
# one-time graph/parameter-static preprocessing (hoisted out of forward)
# --------------------------------------------------------------------------- #
def prepare_hetero_graph(canonical_etypes, ntypes, num_nodes, adj_dict, params,
                         out_size):
    out_pad = _round_up(out_size, 128)                      # lane-dense stores
    tn = out_pad if out_pad <= 512 else _largest_divisor_tile(out_pad, (512, 256, 128))

    # group canonical etypes by destination ntype (cross-etype 'sum' fused)
    groups_members = {}
    for (s, e, d) in canonical_etypes:
        groups_members.setdefault(d, []).append((s, e))

    # per-source-ntype feature padding / linear tiling, padded bf16 weights
    src_pad_info, etype_src, w_pad = {}, {}, {}
    for (s, e, d) in canonical_etypes:
        w_t, _ = params[e]                                  # (in, out)
        in_size = w_t.shape[0]
        in_pad = _round_up(in_size, 128)
        m_pad, tm_lin = _pad_and_tile(num_nodes[s], (256, 128, 64, 32, 16), 16)
        if s not in src_pad_info:
            src_pad_info[s] = (m_pad, tm_lin, in_pad)
        etype_src[e] = s
        wp = jnp.zeros((in_pad, out_pad), jnp.bfloat16)
        w_pad[e] = wp.at[:in_size, :out_size].set(w_t.astype(jnp.bfloat16))

    groups = {}
    for dsttype, members in groups_members.items():
        n_dst = num_nodes[dsttype]
        d_pad, tm = _pad_and_tile(n_dst, (512, 256, 128, 64, 32), 32)
        max_src = max(num_nodes[s] for (s, _) in members)
        s_pad, tk = _pad_and_tile(max_src, (1024, 512, 256, 128), 128)

        # v7x megacore: guarantee >= 2 blocks along the parallel axes if possible
        if (d_pad // tm) * (out_pad // tn) < 2 and tm >= 64 and tm % 64 == 0:
            tm //= 2

        adj_l, inv_l = [], []
        bias_total = jnp.zeros((d_pad, out_pad), jnp.float32)
        for (srctype, etype) in members:
            adj = adj_dict[(srctype, etype, dsttype)]       # (n_dst, n_src) 0/1
            n_src = num_nodes[srctype]
            adj_p = jnp.zeros((d_pad, s_pad), jnp.int8)
            adj_p = adj_p.at[:n_dst, :n_src].set(adj.astype(jnp.int8))
            deg = jnp.sum(adj.astype(jnp.float32), axis=1)  # (n_dst,)
            inv = jnp.where(deg > 0, 1.0 / jnp.maximum(deg, 1.0), 0.0)
            gate = (deg > 0).astype(jnp.float32)
            inv_p = jnp.zeros((d_pad, 1), jnp.float32).at[:n_dst, 0].set(inv)
            _, b = params[etype]
            bias_total = bias_total.at[:n_dst, :out_size].add(
                gate[:, None] * b[None, :])
            adj_l.append(adj_p)
            inv_l.append(inv_p)

        groups[dsttype] = dict(
            members=members,
            adj_stack=jnp.stack(adj_l),        # (n_et, d_pad, s_pad) int8
            inv_stack=jnp.stack(inv_l),        # (n_et, d_pad, 1) f32
            bias_total=bias_total,             # (d_pad, out_pad) f32
            d_pad=d_pad, s_pad=s_pad, tm=tm, tk=tk, tn=tn)

    return dict(ntypes=ntypes, num_nodes=num_nodes, out_size=out_size,
                out_pad=out_pad, groups=groups, src_pad_info=src_pad_info,
                etype_src=etype_src, w_pad=w_pad)


# --------------------------------------------------------------------------- #
# HeteroRGCNLayer.forward equivalent
# --------------------------------------------------------------------------- #
def hetero_rgcn_layer_forward(prepared, feat_dict):
    """Returns {ntype: h} with h of shape (num_nodes[ntype], out_size), f32."""
    num_nodes = prepared["num_nodes"]
    out_size = prepared["out_size"]

    # 1) pad features once per source ntype (the only per-call preprocessing)
    feat_pad = {}
    for nt, (m_pad, _, in_pad) in prepared["src_pad_info"].items():
        f = feat_dict[nt].astype(jnp.bfloat16)
        n, d = f.shape
        feat_pad[nt] = jnp.pad(f, ((0, m_pad - n), (0, in_pad - d)))

    # 2) per-etype linear (bias deferred; each srctype uses its own row padding)
    wh = {}
    for et, srctype in prepared["etype_src"].items():
        _, tm_lin, _ = prepared["src_pad_info"][srctype]
        wh[et] = _linear_bf16(feat_pad[srctype], prepared["w_pad"][et], tm_lin)

    # 3) one fused mean-aggregation + cross-etype sum per destination ntype
    out = {}
    for dsttype, g in prepared["groups"].items():
        wh_l = []
        for (_, et) in g["members"]:
            w = wh[et]
            if w.shape[0] >= g["s_pad"]:
                wh_l.append(w[:g["s_pad"]])
            else:
                wh_l.append(jnp.pad(w, ((0, g["s_pad"] - w.shape[0]), (0, 0))))
        h_pad = rgcn_dst_aggregate(
            g["adj_stack"], jnp.stack(wh_l), g["inv_stack"], g["bias_total"],
            tm=g["tm"], tk=g["tk"], tn=g["tn"])
        out[dsttype] = h_pad[:num_nodes[dsttype], :out_size]

    # ntypes that are never a destination get zeros.
    # TODO(synk): DGL leaves 'h' unset for such ntypes; we zero-fill instead.
    for nt in prepared["ntypes"]:
        if nt not in out:
            out[nt] = jnp.zeros((num_nodes[nt], out_size), jnp.float32)
    return out


# --------------------------------------------------------------------------- #
# pure-JAX references
# --------------------------------------------------------------------------- #
def _reference_forward(canonical_etypes, ntypes, num_nodes,
                       feat_dict, adj_dict, params, out_size, mirror_bf16):
    if mirror_bf16:
        cast = lambda x: x.astype(jnp.bfloat16).astype(jnp.float32)
    else:
        cast = lambda x: x
    out = {nt: jnp.zeros((num_nodes[nt], out_size), jnp.float32)
           for nt in ntypes}
    for (srctype, etype, dsttype) in canonical_etypes:
        w_t, b = params[etype]
        wh = cast(feat_dict[srctype]) @ cast(w_t)
        if mirror_bf16:
            wh = wh.astype(jnp.bfloat16).astype(jnp.float32)
        adj = adj_dict[(srctype, etype, dsttype)]
        deg = adj.sum(axis=1, keepdims=True)
        agg = cast(adj) @ wh
        mean = jnp.where(deg > 0, agg / jnp.maximum(deg, 1.0) + b[None, :], 0.0)
        out[dsttype] = out[dsttype] + mean
    return out


# --------------------------------------------------------------------------- #
# main
# --------------------------------------------------------------------------- #
if __name__ == "__main__":
    key = jax.random.PRNGKey(0)

    # ---- synthetic heterogeneous graph (small, deterministic) ---------------
    in_size, out_size = 32, 64
    ntypes = ["user", "item"]
    num_nodes = {"user": 16, "item": 8}
    canonical_etypes = [
        ("user", "follows", "user"),
        ("user", "buys", "item"),
        ("item", "bought-by", "user"),
    ]
    etypes = [et for (_, et, _) in canonical_etypes]

    # ---- parameters: one nn.Linear(in_size, out_size) per etype -------------
    params = {}
    for i, et in enumerate(etypes):
        kw, kb = jax.random.split(jax.random.fold_in(key, 100 + i))
        scale = 1.0 / jnp.sqrt(jnp.float32(in_size))
        w = jax.random.uniform(kw, (out_size, in_size), jnp.float32,
                               minval=-scale, maxval=scale)  # nn.Linear weight
        b = jax.random.uniform(kb, (out_size,), jnp.float32,
                               minval=-scale, maxval=scale)  # nn.Linear bias
        params[et] = (w.T, b)                                # store W^T, bias

    # ---- node features & dense 0/1 adjacencies (dst x src) ------------------
    feat_dict = {}
    for i, nt in enumerate(ntypes):
        feat_dict[nt] = jax.random.normal(jax.random.fold_in(key, 200 + i),
                                          (num_nodes[nt], in_size), jnp.float32)

    adj_dict = {}
    for i, (src, et, dst) in enumerate(canonical_etypes):
        a = jax.random.bernoulli(jax.random.fold_in(key, 300 + i),
                                 p=0.35, shape=(num_nodes[dst], num_nodes[src]))
        adj_dict[(src, et, dst)] = a.astype(jnp.float32)

    # ---- one-time graph-static preparation, then run Pallas kernels ---------
    prepared = prepare_hetero_graph(canonical_etypes, ntypes, num_nodes,
                                    adj_dict, params, out_size)
    out = hetero_rgcn_layer_forward(prepared, feat_dict)
    out = jax.tree_util.tree_map(jax.block_until_ready, out)

    # ---- correctness: tight vs bf16-mirrored ref, loose vs pure f32 ref ------
    ref_bf16 = _reference_forward(canonical_etypes, ntypes, num_nodes,
                                  feat_dict, adj_dict, params, out_size,
                                  mirror_bf16=True)
    ref_f32 = _reference_forward(canonical_etypes, ntypes, num_nodes,
                                 feat_dict, adj_dict, params, out_size,
                                 mirror_bf16=False)
    for nt in ntypes:
        assert out[nt].shape == (num_nodes[nt], out_size)
        assert jnp.allclose(out[nt], ref_bf16[nt], atol=1e-3, rtol=1e-3), nt
        assert jnp.allclose(out[nt], ref_f32[nt], atol=5e-2, rtol=5e-2), nt

    print("KERNEL_OK")
</pallas_src>

<mosaic_0001>
module attributes {stable_mosaic.version = 11 : i64} {
  func.func @_linear_simple_kernel(%arg0: i32, %arg1: i32, %arg2: memref<16x128xbf16, #tpu.memory_space<vmem>>, %arg3: memref<128x128xbf16, #tpu.memory_space<vmem>>, %arg4: memref<16x128xbf16, #tpu.memory_space<vmem>>) attributes {dimension_semantics = [#tpu.dimension_semantics<parallel>, #tpu.dimension_semantics<parallel>], iteration_bounds = array<i64: 1, 1>, scalar_prefetch = 0 : i64, scratch_operands = 0 : i64, tpu.core_type = #tpu.core_type<tc>, window_params = [{transform_indices = @transform_0, window_bounds = array<i64: 16, 128>}, {transform_indices = @transform_1, window_bounds = array<i64: 128, 128>}, {transform_indices = @transform_2, window_bounds = array<i64: 16, 128>}]} {
    %c0 = arith.constant 0 : index
    %c0_0 = arith.constant 0 : index
    %0 = vector.load %arg2[%c0, %c0_0] : memref<16x128xbf16, #tpu.memory_space<vmem>>, vector<16x128xbf16>
    %c0_1 = arith.constant 0 : index
    %c0_2 = arith.constant 0 : index
    %1 = vector.load %arg3[%c0_1, %c0_2] : memref<128x128xbf16, #tpu.memory_space<vmem>>, vector<128x128xbf16>
    %cst = arith.constant dense<0.000000e+00> : vector<16x128xf32>
    %2 = tpu.matmul %0, %1, %cst {dimension_numbers = #tpu.dot_dimension_numbers<[1], [0], [0], [1], [0, 0, 1, 1], [], []>} : vector<16x128xbf16>, vector<128x128xbf16>, vector<16x128xf32> -> vector<16x128xf32>
    %3 = arith.truncf %2 : vector<16x128xf32> to vector<16x128xbf16>
    %c0_3 = arith.constant 0 : index
    %c0_4 = arith.constant 0 : index
    %4 = vector.load %arg4[%c0_3, %c0_4] : memref<16x128xbf16, #tpu.memory_space<vmem>>, vector<16x128xbf16>
    tpu.vector_store %arg4[%c0_3, %c0_4], %3 {strides = array<i32>} : memref<16x128xbf16, #tpu.memory_space<vmem>>, vector<16x128xbf16>,
    return
  }
  func.func @transform_0(%arg0: i32, %arg1: i32) -> (i32, i32) {
    %c0_i32 = arith.constant 0 : i32
    %c0_i32_0 = arith.constant 0 : i32
    return %arg0, %c0_i32 : i32, i32
  }
  func.func @transform_1(%arg0: i32, %arg1: i32) -> (i32, i32) {
    %c0_i32 = arith.constant 0 : i32
    %c0_i32_0 = arith.constant 0 : i32
    return %c0_i32, %arg1 : i32, i32
  }
  func.func @transform_2(%arg0: i32, %arg1: i32) -> (i32, i32) {
    %c0_i32 = arith.constant 0 : i32
    return %arg0, %arg1 : i32, i32
  }
}

</mosaic_0001>

<bundles_post_ra>
// kernel: tpu_custom_call.1
= control target key start
LH: loop header
LB: loop body
LE: loop exit
PB: predicated region body
PF: predicated region fallthrough
CT: control target
= control target key end

     0   :  { %7 = vsyncpa [#allocation3], 0  ;;  %s325_s0 = inlined_call_operand.hbm [shape: bf16[16,128], index: 0, kind: input, shape index: {}]   ;;  %s326_s1 = inlined_call_operand.hbm [shape: bf16[128,128], index: 1, kind: input, shape index: {}]   ;;  %s327_s2 = inlined_call_operand.hbm [shape: bf16[16,128], index: 2, kind: output, shape index: {}]  }
   0x1   :  { %8 = vsyncpa [#allocation6], 0 }
   0x2   :  { %9 = vsyncpa [#allocation4], 0  ;;  %s14_s11 = sshll.u32 %s325_s0, 4  ;;  %s287_s12 = smov [#allocation2]   ;;  %s15_s11 = int_to_ptr.hbm [resolvable:$true] %s14_s11 }
   0x3   :  { %s16_s13 = sshll.u32 %s287_s12, 4  ;;  %s27_s16 = sshll.u32 %s326_s1, 4  ;;  %s17_s13 = int_to_ptr.vmem [resolvable:$true] %s16_s13  ;;  %s28_s16 = int_to_ptr.hbm [resolvable:$true] %s27_s16 }
   0x4   :  { %s288_s17 = smov 64   ;;  %s289_s18 = smov 4  }
   0x5   :  { %22 = dma.hbm_to_vmem [thread:$0]  %s15_s11, 128, %s17_s13, [#allocation3], %s288_s17, %s288_s17, %s289_s18  }
   0x6   :  { %s290_s19 = smov [#allocation5]  }
   0x7   :  { %s29_s20 = sshll.u32 %s290_s19, 4  ;;  %s30_s20 = int_to_ptr.vmem [resolvable:$true] %s29_s20 }
   0x8   :  { %35 = dma.hbm_to_vmem [thread:$0]  %s28_s16, 1024, %s30_s20, [#allocation6], %s288_s17, %s288_s17, %s289_s18  }
   0x9   :  { %281 = dma.done.wait [#allocation3], 128  }
   0xa   :  { %282 = vsyncadd [#allocation3], 4294967168 }
   0xb   :  { %283 = dma.done.wait [#allocation6], 1024  }
   0xc   :  { %284 = vsyncadd [#allocation6], 4294966272  ;;  %v198_v0 = vld [vmem:[#allocation5 + $0x38] sm:$0xff]  ;;  %v197_v1 = vld [vmem:[#allocation5 + $0x30] sm:$0xff]  ;;  %s291_s0 = smov [#allocation7]   ;;  %s140_s23 = sshll.u32 %s327_s2, 4  ;;  %s141_s23 = int_to_ptr.hbm [resolvable:$true] %s140_s23 }
   0xd   :  { %116 = vmatpush.bf16.msra.mxu0 %v198_v0  ;;  %v196_v2 = vld [vmem:[#allocation5 + $0x28] sm:$0xff]  ;;  %v195_v3 = vld [vmem:[#allocation5 + $0x20] sm:$0xff]  ;;  %v194_v4 = vld [vmem:[#allocation5 + $0x18] sm:$0xff]  ;;  %s138_s1 = sshll.u32 %s291_s0, 4  ;;  %s139_s1 = int_to_ptr.vmem [resolvable:$true] %s138_s1 }
   0xe   :  { %v193_v5 = vld [vmem:[#allocation5 + $0x10] sm:$0xff]  ;;  %v192_v6 = vld [vmem:[#allocation5 + $0x8] sm:$0xff]  ;;  %v191_v7 = vld [vmem:[#allocation5] sm:$0xff] }
   0xf   :  { %v190_v8 = vld [vmem:[#allocation2] sm:$0xff] }
  0x11   :  { %117 = vmatpush.bf16.msra.mxu0 %v197_v1 }
  0x15   :  { %118 = vmatpush.bf16.msra.mxu0 %v196_v2 }
  0x19   :  { %119 = vmatpush.bf16.msra.mxu0 %v195_v3 }
  0x1d   :  { %120 = vmatpush.bf16.msra.mxu0 %v194_v4 }
  0x21   :  { %121 = vmatpush.bf16.msra.mxu0 %v193_v5 }
  0x25   :  { %122 = vmatpush.bf16.msra.mxu0 %v192_v6 }
  0x29   :  { %123 = vmatpush.bf16.msra.mxu0 %v191_v7 }
  0x2c   :  { %124 = vmatmul.bf16.vlgmr.msra.gmra.mxu0 %v190_v8 }
  0xa9   :  { %v125_v9 = vpop.f32.mrf.mxu0 }
  0xb1   :  { %v127_v10 = vpop.f32.mrf.mxu0 }
  0xb2   :  { %v202_v11 = vpack.c.bf16 %v127_v10, %v125_v9 }
  0xb4   :  { %203 = vst [vmem:[#allocation7] sm:$0xff] %v202_v11  }
  0xb5   :  { %146 = dma.vmem_to_hbm [thread:$0]  %s139_s1, 128, %s141_s23, [#allocation4], %s288_s17, %s288_s17, %s289_s18  }
  0xb6   :  { %285 = dma.done.wait [#allocation4], 128  }
  0xb7   :  { %286 = vsyncadd [#allocation4], 4294967168 }
  0xb8   :  { %151 = vsyncpa [#allocation3], 1 }
  0xb9   :  { %152 = vsyncpa [#allocation6], 1 }
  0xba   :  { %153 = vsyncpa [#allocation4], 1 }

</bundles_post_ra>
